<compile_context>
chip_gen: v6e
topology: v6e:2x2x1
jax: 0.10.0
libtpu: 0.0.40
codegen_flags: <defaults>
</compile_context>

<pallas_src>
import jax
import jax.numpy as jnp
from jax.experimental import pallas as pl
from jax.experimental.pallas import tpu as pltpu

H1 = 1024          # layer1 hidden size (fixed by the module)
H2 = 256           # layer2 hidden size (fixed by the module)
LANES = 128        # TPU lane width
VMEM_LIMIT_BYTES = 32 * 1024 * 1024    # < physical VMEM on v5e/v6e (128 MiB) and v7x (64 MiB)
VMEM_BUDGET_BYTES = 24 * 1024 * 1024   # footprint target with headroom under the limit


def _mlp_kernel(x_ref, w1_ref, b1_ref, w2_ref, b2_ref, w3_ref, b3_ref, o_ref):
    # Fused 3-layer MLP on one batch tile.  x arrives f32 straight from HBM and
    # is cast to bf16 in-register (no separate XLA cast pass / extra x copy).
    # bf16 operands hit the MXU with f32 accumulation; bias-add + ReLU run in
    # f32 on the VPU (portable to v5e, which has no bf16 VALU).
    x = x_ref[...].astype(jnp.bfloat16)
    h1 = jnp.dot(x, w1_ref[...], preferred_element_type=jnp.float32)
    h1 = jnp.maximum(h1 + b1_ref[...], 0.0)
    h2 = jnp.dot(h1.astype(jnp.bfloat16), w2_ref[...],
                 preferred_element_type=jnp.float32)
    h2 = jnp.maximum(h2 + b2_ref[...], 0.0)
    out = jnp.dot(h2.astype(jnp.bfloat16), w3_ref[...],
                  preferred_element_type=jnp.float32) + b3_ref[...]
    o_ref[...] = out.astype(o_ref.dtype)


def _round_up(n, m):
    return ((n + m - 1) // m) * m


def _pick_tile_b(B):
    # Bigger tiles amortize per-grid-step overhead; mid batches keep >=2 tiles
    # so both v7x TensorCores stay busy; tiny batches run as a single tile.
    if B >= 4096:
        return 1024
    if B >= 2048:
        return 512
    if B >= 512:
        return 256
    if B >= 256:
        return 128
    if B >= 128:
        return _round_up((B + 1) // 2, 8)   # 2 tiles for the 2 v7x cores
    return B


def _cap_tile_for_vmem(tile_b, d_in, d_out_pad):
    # Rough footprint: resident bf16 weights (single-buffered) + f32 x / out
    # tiles (double-buffered) + f32 intermediates.  Shrink the tile rather than
    # spill — matters on v5e (16 MiB default scoped) and v7x (64 MiB physical,
    # weights resident per-TensorCore).
    w_bytes = (d_in * H1 + H1 * H2 + H2 * d_out_pad) * 2 \
              + (H1 + H2 + d_out_pad) * 4

    def tile_bytes(tb):
        return 2 * tb * d_in * 4 + 2 * tb * d_out_pad * 4 + tb * (H1 + H2) * 4

    while tile_b > 128 and w_bytes + tile_bytes(tile_b) > VMEM_BUDGET_BYTES:
        tile_b //= 2
    return tile_b


def prepare_params(params):
    """One-time conversion to kernel-ready layout (call once, reuse across
    forwards): bf16 weights for the MXU, f32 (1, N) biases, and W3/b3 padded to
    a lane-dense multiple-of-128 output width."""
    w1, b1 = params["w1"], params["b1"]
    w2, b2 = params["w2"], params["b2"]
    w3, b3 = params["w3"], params["b3"]
    d_out = int(w3.shape[1])
    d_out_pad = _round_up(max(d_out, LANES), LANES)

    w3p = jnp.zeros((H2, d_out_pad), jnp.float32).at[:, :d_out].set(w3)
    b3p = jnp.zeros((d_out_pad,), jnp.float32).at[:d_out].set(b3)

    return {
        "w1": w1.astype(jnp.bfloat16),
        "b1": b1.reshape(1, H1).astype(jnp.float32),
        "w2": w2.astype(jnp.bfloat16),
        "b2": b2.reshape(1, H2).astype(jnp.float32),
        "w3": w3p.astype(jnp.bfloat16),
        "b3": b3p.reshape(1, d_out_pad).astype(jnp.float32),
        "d_out": d_out,
    }


def base_nn_forward(x, kparams, *, tile_b=None):
    """Pallas implementation of BaseNN.forward.

    x:       (B, input_dim) float32
    kparams: output of prepare_params(...)
    Returns  (B, output_dim) float32.
    """
    w1b, b1r = kparams["w1"], kparams["b1"]
    w2b, b2r = kparams["w2"], kparams["b2"]
    w3b, b3r = kparams["w3"], kparams["b3"]
    d_out = kparams["d_out"]

    B, d_in = x.shape
    d_out_pad = w3b.shape[1]

    if tile_b is None:
        tile_b = _pick_tile_b(B)
    tile_b = max(1, min(tile_b, B))
    if tile_b < B:
        # sublane alignment when actually tiled (f32 x / out blocks -> 8 rows)
        tile_b = min(_round_up(tile_b, 8), B)
    tile_b = _cap_tile_for_vmem(tile_b, d_in, d_out_pad)

    num_tiles = pl.cdiv(B, tile_b)

    # Weights / biases never change across the batch grid -> single-buffer them
    # (halves their VMEM footprint vs default double-buffering).
    resident = pl.Buffered(1)
    # TODO(synk): for very large input_dim (>= ~8K) W1 should additionally be
    # K-tiled over a trailing "arbitrary" grid axis (K tile a multiple of 256,
    # f32 VMEM accumulator with pl.when init/finalize) instead of one resident
    # block.

    out = pl.pallas_call(
        _mlp_kernel,
        out_shape=jax.ShapeDtypeStruct((B, d_out_pad), jnp.float32),
        grid=(num_tiles,),
        in_specs=[
            pl.BlockSpec((tile_b, d_in), lambda i: (i, 0)),                           # x tile (f32)
            pl.BlockSpec((d_in, H1), lambda i: (0, 0), pipeline_mode=resident),       # W1
            pl.BlockSpec((1, H1), lambda i: (0, 0), pipeline_mode=resident),          # b1
            pl.BlockSpec((H1, H2), lambda i: (0, 0), pipeline_mode=resident),         # W2
            pl.BlockSpec((1, H2), lambda i: (0, 0), pipeline_mode=resident),          # b2
            pl.BlockSpec((H2, d_out_pad), lambda i: (0, 0), pipeline_mode=resident),  # W3 (lane-padded)
            pl.BlockSpec((1, d_out_pad), lambda i: (0, 0), pipeline_mode=resident),   # b3 (lane-padded)
        ],
        out_specs=pl.BlockSpec((tile_b, d_out_pad), lambda i: (i, 0)),
        compiler_params=pltpu.CompilerParams(
            dimension_semantics=("parallel",),     # batch tiles -> both v7x cores
            vmem_limit_bytes=VMEM_LIMIT_BYTES,
        ),
    )(x.astype(jnp.float32), w1b, b1r, w2b, b2r, w3b, b3r)

    if d_out_pad != d_out:
        out = out[:, :d_out]
    return out


def init_params(key, input_dim, output_dim):
    """Deterministic init mirroring nn.Linear default (uniform +/- 1/sqrt(fan_in))."""
    ks = jax.random.split(key, 6)

    def lin(kw, kb, fan_in, fan_out):
        bound = 1.0 / jnp.sqrt(fan_in)
        w = jax.random.uniform(kw, (fan_in, fan_out), jnp.float32, -bound, bound)
        b = jax.random.uniform(kb, (fan_out,), jnp.float32, -bound, bound)
        return w, b

    w1, b1 = lin(ks[0], ks[1], input_dim, H1)
    w2, b2 = lin(ks[2], ks[3], H1, H2)
    w3, b3 = lin(ks[4], ks[5], H2, output_dim)
    return {"w1": w1, "b1": b1, "w2": w2, "b2": b2, "w3": w3, "b3": b3}


def _reference(x, p, compute_dtype=jnp.float32):
    """Pure-JAX reference.  compute_dtype=bf16 mimics the kernel's mixed precision."""
    cd = compute_dtype
    h1 = jnp.maximum(jnp.dot(x.astype(cd), p["w1"].astype(cd),
                             preferred_element_type=jnp.float32) + p["b1"], 0.0)
    h2 = jnp.maximum(jnp.dot(h1.astype(cd), p["w2"].astype(cd),
                             preferred_element_type=jnp.float32) + p["b2"], 0.0)
    return jnp.dot(h2.astype(cd), p["w3"].astype(cd),
                   preferred_element_type=jnp.float32) + p["b3"]


if __name__ == "__main__":
    key = jax.random.PRNGKey(0)
    k_x, k_p, k_x2, k_x3 = jax.random.split(key, 4)

    input_dim = 32
    output_dim = 8
    params = init_params(k_p, input_dim, output_dim)
    kparams = prepare_params(params)   # one-time bf16 cast + lane padding

    def check(x):
        out = jax.block_until_ready(base_nn_forward(x, kparams))
        assert out.shape == (x.shape[0], output_dim)
        assert out.dtype == jnp.float32
        ref_mixed = _reference(x, params, compute_dtype=jnp.bfloat16)
        ref_f32 = _reference(x, params, compute_dtype=jnp.float32)
        assert jnp.allclose(out, ref_mixed, atol=5e-3, rtol=5e-3)
        assert jnp.allclose(out, ref_f32, atol=5e-2, rtol=5e-2)

    # single-tile path (B < 128)
    check(jax.random.normal(k_x, (8, input_dim), jnp.float32))
    # two balanced tiles with a ragged last tile (B=200 -> tile 104, grid 2)
    check(jax.random.normal(k_x2, (200, input_dim), jnp.float32))
    # 128-row tiles with a ragged last tile (B=300 -> tile 128, grid 3)
    check(jax.random.normal(k_x3, (300, input_dim), jnp.float32))

    print("KERNEL_OK")
</pallas_src>

<mosaic_0001>
module attributes {stable_mosaic.version = 11 : i64} {
  func.func @_mlp_kernel(%arg0: i32, %arg1: memref<8x32xf32, #tpu.memory_space<vmem>>, %arg2: memref<32x1024xbf16, #tpu.memory_space<vmem>>, %arg3: memref<1x1024xf32, #tpu.memory_space<vmem>>, %arg4: memref<1024x256xbf16, #tpu.memory_space<vmem>>, %arg5: memref<1x256xf32, #tpu.memory_space<vmem>>, %arg6: memref<256x128xbf16, #tpu.memory_space<vmem>>, %arg7: memref<1x128xf32, #tpu.memory_space<vmem>>, %arg8: memref<8x128xf32, #tpu.memory_space<vmem>>) attributes {dimension_semantics = [#tpu.dimension_semantics<parallel>], iteration_bounds = array<i64: 1>, scalar_prefetch = 0 : i64, scratch_operands = 0 : i64, tpu.core_type = #tpu.core_type<tc>, window_params = [{transform_indices = @transform_0, window_bounds = array<i64: 8, 32>}, {pipeline_mode = #tpu.pipeline_mode<synchronous>, transform_indices = @transform_1, window_bounds = array<i64: 32, 1024>}, {pipeline_mode = #tpu.pipeline_mode<synchronous>, transform_indices = @transform_2, window_bounds = array<i64: 1, 1024>}, {pipeline_mode = #tpu.pipeline_mode<synchronous>, transform_indices = @transform_3, window_bounds = array<i64: 1024, 256>}, {pipeline_mode = #tpu.pipeline_mode<synchronous>, transform_indices = @transform_4, window_bounds = array<i64: 1, 256>}, {pipeline_mode = #tpu.pipeline_mode<synchronous>, transform_indices = @transform_5, window_bounds = array<i64: 256, 128>}, {pipeline_mode = #tpu.pipeline_mode<synchronous>, transform_indices = @transform_6, window_bounds = array<i64: 1, 128>}, {transform_indices = @transform_7, window_bounds = array<i64: 8, 128>}]} {
    %c0 = arith.constant 0 : index
    %c0_0 = arith.constant 0 : index
    %0 = vector.load %arg1[%c0, %c0_0] : memref<8x32xf32, #tpu.memory_space<vmem>>, vector<8x32xf32>
    %1 = arith.truncf %0 : vector<8x32xf32> to vector<8x32xbf16>
    %c0_1 = arith.constant 0 : index
    %c0_2 = arith.constant 0 : index
    %2 = vector.load %arg2[%c0_1, %c0_2] : memref<32x1024xbf16, #tpu.memory_space<vmem>>, vector<32x1024xbf16>
    %cst = arith.constant dense<0.000000e+00> : vector<8x1024xf32>
    %3 = tpu.matmul %1, %2, %cst {dimension_numbers = #tpu.dot_dimension_numbers<[1], [0], [0], [1], [0, 0, 1, 1], [], []>} : vector<8x32xbf16>, vector<32x1024xbf16>, vector<8x1024xf32> -> vector<8x1024xf32>
    %c0_3 = arith.constant 0 : index
    %c0_4 = arith.constant 0 : index
    %4 = vector.load %arg3[%c0_3, %c0_4] : memref<1x1024xf32, #tpu.memory_space<vmem>>, vector<1x1024xf32>
    %5 = vector.broadcast %4 : vector<1x1024xf32> to vector<8x1024xf32>
    %6 = arith.addf %3, %5 : vector<8x1024xf32>
    %cst_5 = arith.constant 0.000000e+00 : f32
    %7 = vector.broadcast %cst_5 : f32 to vector<8x1024xf32>
    %8 = arith.maximumf %6, %7 : vector<8x1024xf32>
    %9 = arith.truncf %8 : vector<8x1024xf32> to vector<8x1024xbf16>
    %c0_6 = arith.constant 0 : index
    %c0_7 = arith.constant 0 : index
    %10 = vector.load %arg4[%c0_6, %c0_7] : memref<1024x256xbf16, #tpu.memory_space<vmem>>, vector<1024x256xbf16>
    %cst_8 = arith.constant dense<0.000000e+00> : vector<8x256xf32>
    %11 = tpu.matmul %9, %10, %cst_8 {dimension_numbers = #tpu.dot_dimension_numbers<[1], [0], [0], [1], [0, 0, 1, 1], [], []>} : vector<8x1024xbf16>, vector<1024x256xbf16>, vector<8x256xf32> -> vector<8x256xf32>
    %c0_9 = arith.constant 0 : index
    %c0_10 = arith.constant 0 : index
    %12 = vector.load %arg5[%c0_9, %c0_10] : memref<1x256xf32, #tpu.memory_space<vmem>>, vector<1x256xf32>
    %13 = vector.broadcast %12 : vector<1x256xf32> to vector<8x256xf32>
    %14 = arith.addf %11, %13 : vector<8x256xf32>
    %cst_11 = arith.constant 0.000000e+00 : f32
    %15 = vector.broadcast %cst_11 : f32 to vector<8x256xf32>
    %16 = arith.maximumf %14, %15 : vector<8x256xf32>
    %17 = arith.truncf %16 : vector<8x256xf32> to vector<8x256xbf16>
    %c0_12 = arith.constant 0 : index
    %c0_13 = arith.constant 0 : index
    %18 = vector.load %arg6[%c0_12, %c0_13] : memref<256x128xbf16, #tpu.memory_space<vmem>>, vector<256x128xbf16>
    %cst_14 = arith.constant dense<0.000000e+00> : vector<8x128xf32>
    %19 = tpu.matmul %17, %18, %cst_14 {dimension_numbers = #tpu.dot_dimension_numbers<[1], [0], [0], [1], [0, 0, 1, 1], [], []>} : vector<8x256xbf16>, vector<256x128xbf16>, vector<8x128xf32> -> vector<8x128xf32>
    %c0_15 = arith.constant 0 : index
    %c0_16 = arith.constant 0 : index
    %20 = vector.load %arg7[%c0_15, %c0_16] : memref<1x128xf32, #tpu.memory_space<vmem>>, vector<1x128xf32>
    %21 = vector.broadcast %20 : vector<1x128xf32> to vector<8x128xf32>
    %22 = arith.addf %19, %21 : vector<8x128xf32>
    %c0_17 = arith.constant 0 : index
    %c0_18 = arith.constant 0 : index
    %23 = vector.load %arg8[%c0_17, %c0_18] : memref<8x128xf32, #tpu.memory_space<vmem>>, vector<8x128xf32>
    tpu.vector_store %arg8[%c0_17, %c0_18], %22 {strides = array<i32>} : memref<8x128xf32, #tpu.memory_space<vmem>>, vector<8x128xf32>,
    return
  }
  func.func @transform_0(%arg0: i32) -> (i32, i32) {
    %c0_i32 = arith.constant 0 : i32
    %c0_i32_0 = arith.constant 0 : i32
    return %arg0, %c0_i32 : i32, i32
  }
  func.func @transform_1(%arg0: i32) -> (i32, i32) {
    %c0_i32 = arith.constant 0 : i32
    %c0_i32_0 = arith.constant 0 : i32
    %c0_i32_1 = arith.constant 0 : i32
    return %c0_i32, %c0_i32_0 : i32, i32
  }
  func.func @transform_2(%arg0: i32) -> (i32, i32) {
    %c0_i32 = arith.constant 0 : i32
    %c0_i32_0 = arith.constant 0 : i32
    %c0_i32_1 = arith.constant 0 : i32
    return %c0_i32, %c0_i32_0 : i32, i32
  }
  func.func @transform_3(%arg0: i32) -> (i32, i32) {
    %c0_i32 = arith.constant 0 : i32
    %c0_i32_0 = arith.constant 0 : i32
    %c0_i32_1 = arith.constant 0 : i32
    return %c0_i32, %c0_i32_0 : i32, i32
  }
  func.func @transform_4(%arg0: i32) -> (i32, i32) {
    %c0_i32 = arith.constant 0 : i32
    %c0_i32_0 = arith.constant 0 : i32
    %c0_i32_1 = arith.constant 0 : i32
    return %c0_i32, %c0_i32_0 : i32, i32
  }
  func.func @transform_5(%arg0: i32) -> (i32, i32) {
    %c0_i32 = arith.constant 0 : i32
    %c0_i32_0 = arith.constant 0 : i32
    %c0_i32_1 = arith.constant 0 : i32
    return %c0_i32, %c0_i32_0 : i32, i32
  }
  func.func @transform_6(%arg0: i32) -> (i32, i32) {
    %c0_i32 = arith.constant 0 : i32
    %c0_i32_0 = arith.constant 0 : i32
    %c0_i32_1 = arith.constant 0 : i32
    return %c0_i32, %c0_i32_0 : i32, i32
  }
  func.func @transform_7(%arg0: i32) -> (i32, i32) {
    %c0_i32 = arith.constant 0 : i32
    %c0_i32_0 = arith.constant 0 : i32
    return %arg0, %c0_i32 : i32, i32
  }
}

</mosaic_0001>

<bundles_post_ra>
// kernel: tpu_custom_call.1
= control target key start
LH: loop header
LB: loop body
LE: loop exit
PB: predicated region body
PF: predicated region fallthrough
CT: control target
= control target key end

     0   :  { %12 = vsyncpa [#allocation3], 0  ;;  %s2218_s0 = inlined_call_operand.hbm [shape: f32[8,32], index: 0, kind: input, shape index: {}]   ;;  %s2219_s1 = inlined_call_operand.hbm [shape: bf16[32,1024], index: 1, kind: input, shape index: {}]   ;;  %s2220_s2 = inlined_call_operand.hbm [shape: f32[1,1024], index: 2, kind: input, shape index: {}]   ;;  %s2221_s3 = inlined_call_operand.hbm [shape: bf16[1024,256], index: 3, kind: input, shape index: {}]   ;;  %s2222_s4 = inlined_call_operand.vmem [shape: f32[1,256], index: 4, kind: input, shape index: {}]   ;;  %s2223_s5 = inlined_call_operand.hbm [shape: bf16[256,128], index: 5, kind: input, shape index: {}]   ;;  %s2224_s6 = inlined_call_operand.vmem [shape: f32[1,128], index: 6, kind: input, shape index: {}]   ;;  %s2225_s7 = inlined_call_operand.hbm [shape: f32[8,128], index: 7, kind: output, shape index: {}]  }
   0x1   :  { %13 = vsyncpa [#allocation6], 0 }
   0x2   :  { %14 = vsyncpa [#allocation9], 0 }
   0x3   :  { %15 = vsyncpa [#allocation4], 0  ;;  %s2093_s24 = smov [#allocation5]  }
   0x4   :  { %s31_s25 = sshll.u32 %s2093_s24, 4  ;;  %s32_s25 = int_to_ptr.vmem [resolvable:$true] %s31_s25 }
   0x5   :  { %s1973_s26 = scalar_lea.vmem %s32_s25, 2048  ;;  %p1978_p1 = scmp.lt.s32.totalorder %s32_s25, %s32_s25 }
   0x6   :  { %p1974_p0 = scmp.ne.s32.totalorder %s32_s25, %s1973_s26  ;;  %p1979_p2 = scmp.lt.s32.totalorder %s1973_s26, %s1973_s26 }
   0x8   :  { %p1980_p3 = por %p1979_p2, %p1978_p1 }
   0xa   :  { %p1981_p4 = pnand %p1980_p3, %p1974_p0 }
   0xc   :  { %1984 = shalt.err (!%p1981_p4)
}
   0xd   :  { %s2094_s27 = smov 512   ;;  %s2095_s28 = smov 32  }
   0xe   :  { %37 = dma.hbm_to_vmem [thread:$0]  %s2219_s1, 2048, %s32_s25, [#allocation6], %s2094_s27, %s2094_s27, %s2095_s28  }
   0xf   :  { %s2096_s8 = smov [#allocation8]  }
  0x10   :  { %s53_s9 = sshll.u32 %s2096_s8, 4  ;;  %s54_s9 = int_to_ptr.vmem [resolvable:$true] %s53_s9 }
  0x11   :  { %s1993_s10 = scalar_lea.vmem %s54_s9, 16384  ;;  %p1998_p6 = scmp.lt.s32.totalorder %s54_s9, %s54_s9 }
  0x12   :  { %p1994_p5 = scmp.ne.s32.totalorder %s54_s9, %s1993_s10  ;;  %p1999_p7 = scmp.lt.s32.totalorder %s1993_s10, %s1993_s10 }
  0x14   :  { %p2000_p8 = por %p1999_p7, %p1998_p6 }
  0x16   :  { %p2001_p9 = pnand %p2000_p8, %p1994_p5 }
  0x18   :  { %2004 = shalt.err (!%p2001_p9)
}
  0x19   :  { %s2097_s11 = smov 128   ;;  %s2098_s12 = smov 8  }
  0x1a   :  { %59 = dma.hbm_to_vmem [thread:$0]  %s2221_s3, 16384, %s54_s9, [#allocation9], %s2097_s11, %s2097_s11, %s2098_s12  }
  0x1b   :  { %s2099_s15 = smov [#allocation2]   ;;  %s2100_s17 = smov [#allocation7]  }
  0x1c   :  { %s22_s16 = sshll.u32 %s2099_s15, 4  ;;  %s44_s1 = sshll.u32 %s2100_s17, 4  ;;  %s23_s16 = int_to_ptr.vmem [resolvable:$true] %s22_s16  ;;  %s45_s1 = int_to_ptr.vmem [resolvable:$true] %s44_s1 }
  0x1d   :  { %s2013_s18 = scalar_lea.vmem %s23_s16, 128  ;;  %p2018_p11 = scmp.lt.s32.totalorder %s23_s16, %s23_s16 }
  0x1e   :  { %p2014_p10 = scmp.ne.s32.totalorder %s23_s16, %s2013_s18  ;;  %p2019_p12 = scmp.lt.s32.totalorder %s2013_s18, %s2013_s18 }
  0x20   :  { %p2020_p13 = por %p2019_p12, %p2018_p11 }
  0x22   :  { %p2021_p0 = pnand %p2020_p13, %p2014_p10 }
  0x24   :  { %2024 = shalt.err (!%p2021_p0)
}
  0x25   :  { %25 = dma.hbm_to_vmem [thread:$0]  %s2218_s0, 128, %s23_s16, [#allocation3]  }
  0x26   :  { %s2033_s21 = scalar_lea.vmem %s45_s1, 128  ;;  %p2038_p2 = scmp.lt.s32.totalorder %s45_s1, %s45_s1 }
  0x27   :  { %p2034_p1 = scmp.ne.s32.totalorder %s45_s1, %s2033_s21  ;;  %p2039_p3 = scmp.lt.s32.totalorder %s2033_s21, %s2033_s21 }
  0x29   :  { %p2040_p4 = por %p2039_p3, %p2038_p2 }
  0x2b   :  { %p2041_p5 = pnand %p2040_p4, %p2034_p1 }
  0x2d   :  { %2044 = shalt.err (!%p2041_p5)
}
  0x2e   :  { %47 = dma.hbm_to_vmem [thread:$0]  %s2220_s2, 128, %s45_s1, [#allocation6]  }
  0x2f   :  { %s2101_s23 = smov [#allocation10]  }
  0x30   :  { %s67_s24 = sshll.u32 %s2101_s23, 4  ;;  %s68_s24 = int_to_ptr.vmem [resolvable:$true] %s67_s24 }
  0x31   :  { %s2053_s25 = scalar_lea.vmem %s68_s24, 2048  ;;  %p2058_p7 = scmp.lt.s32.totalorder %s68_s24, %s68_s24 }
  0x32   :  { %p2054_p6 = scmp.ne.s32.totalorder %s68_s24, %s2053_s25  ;;  %p2059_p8 = scmp.lt.s32.totalorder %s2053_s25, %s2053_s25 }
  0x34   :  { %p2060_p9 = por %p2059_p8, %p2058_p7 }
  0x36   :  { %p2061_p10 = pnand %p2060_p9, %p2054_p6 }
  0x38   :  { %2064 = shalt.err (!%p2061_p10)
}
  0x39   :  { %s2102_s0 = smov 64   ;;  %s2103_s26 = smov 4  }
  0x3a   :  { %73 = dma.hbm_to_vmem [thread:$0]  %s2223_s5, 2048, %s68_s24, [#allocation9], %s2102_s0, %s2102_s0, %s2103_s26  }
  0x3b   :  { %2085 = dma.done.wait [#allocation3], 128  }
  0x3c   :  { %2086 = vsyncadd [#allocation3], 4294967168 }
  0x3d   :  { %2087 = dma.done.wait [#allocation6], 2176  }
  0x3e   :  { %2088 = vsyncadd [#allocation6], 4294965120 }
  0x3f   :  { %2089 = dma.done.wait [#allocation9], 18432  }
  0x40   :  { %2090 = vsyncadd [#allocation9], 4294948864  ;;  %v2104_v0 = vmov 0   ;;  %v102_v1 = vld [vmem:[#allocation5 + $0x40] sm:$0xff]  ;;  %v103_v8 = vld [vmem:[#allocation5 + $0x48] sm:$0xff]  ;;  %vm232_vm0 = vcmask 261120  }
  0x41   :  { %268 = vmatprep.mubr.bf16.mxu1 %v2104_v0  ;;  %v106_v2 = vld [vmem:[#allocation5 + $0x60] sm:$0xff]  ;;  %v107_v9 = vld [vmem:[#allocation5 + $0x68] sm:$0xff]  ;;  %v92_v11 = vld [vmem:[#allocation2] sm:$0xff]  ;;  %s2105_s30 = smov [#allocation11]  }
  0x42   :  { %v94_v3 = vld [vmem:[#allocation5] sm:$0xff]  ;;  %v1566_v4 = vcombine.high %v102_v1, %v106_v2  ;;  %v1565_v5 = vcombine.low %v102_v1, %v106_v2  ;;  %v1568_v12 = vcombine.high %v103_v8, %v107_v9  ;;  %v95_v13 = vld [vmem:[#allocation5 + $0x8] sm:$0xff]  ;;  %v2162_v17 = vpack.c.bf16 %v92_v11, %v92_v11  ;;  %v104_v22 = vld [vmem:[#allocation5 + $0x50] sm:$0xff]  ;;  %s1546_s8 = sshll.u32 %s2105_s30, 4  ;;  %s1547_s8 = int_to_ptr.vmem [resolvable:$true] %s1546_s8 }
  0x43   :  { %v98_v6 = vld [vmem:[#allocation5 + $0x20] sm:$0xff]  ;;  %v99_v14 = vld [vmem:[#allocation5 + $0x28] sm:$0xff]  ;;  %v1567_v19 = vcombine.low %v103_v8, %v107_v9  ;;  %v108_v23 = vld [vmem:[#allocation5 + $0x70] sm:$0xff]  ;;  %s2065_s9 = scalar_lea.vmem %s1547_s8, 128  ;;  %p2070_p12 = scmp.lt.s32.totalorder %s1547_s8, %s1547_s8 }
  0x44   :  { %v1558_v7 = vcombine.high %v94_v3, %v98_v6  ;;  %248 = vmatprep.subr.bf16.mxu1 %v1566_v4  ;;  %v1557_v10 = vcombine.low %v94_v3, %v98_v6  ;;  %v1757_v15 = vld [vmem:[#allocation8 + $0x74] ss:$8 sps:$4 sm:$0xff]   ;;  %v1759_v16 = vld [vmem:[#allocation8 + $0x70] ss:$8 sps:$4 sm:$0xff]   ;;  %v1760_v18 = vld [vmem:[#allocation8 + $0x64] ss:$8 sps:$4 sm:$0xff]   ;;  %v1560_v20 = vcombine.high %v95_v13, %v99_v14  ;;  %v1559_v25 = vcombine.low %v95_v13, %v99_v14  ;;  %p2066_p11 = scmp.ne.s32.totalorder %s1547_s8, %s2065_s9  ;;  %p2071_p13 = scmp.lt.s32.totalorder %s2065_s9, %s2065_s9 }
  0x45   :  { %249 = vmatpush1.bf16.msra.mxu1 %v1565_v5  ;;  %1196 = vmatprep.subr.bf16.mxu0 %v1757_v15  ;;  %v1762_v21 = vld [vmem:[#allocation8 + $0x60] ss:$8 sps:$4 sm:$0xff]   ;;  %v1763_v24 = vld [vmem:[#allocation8 + $0x54] ss:$8 sps:$4 sm:$0xff]   ;;  %v1570_v27 = vcombine.high %v104_v22, %v108_v23  ;;  %v1768_v29 = vld [vmem:[#allocation8 + $0x50] ss:$8 sps:$4 sm:$0xff]   ;;  %v1569_v31 = vcombine.low %v104_v22, %v108_v23 }
  0x46   :  { %250 = vmatprep.subr.bf16.mxu1 %v1558_v7  ;;  %1197 = vmatpush1.bf16.msra.mxu0 %v1759_v16  ;;  %v96_v26 = vld [vmem:[#allocation5 + $0x10] sm:$0xff]  ;;  %v105_v34 = vld [vmem:[#allocation5 + $0x58] sm:$0xff]  ;;  %p2072_p0 = por %p2071_p13, %p2070_p12 }
  0x47   :  { %1198 = vmatprep.subr.bf16.mxu0 %v1760_v18  ;;  %v100_v28 = vld [vmem:[#allocation5 + $0x30] sm:$0xff]  ;;  %v109_v35 = vld [vmem:[#allocation5 + $0x78] sm:$0xff] }
  0x48   :  { %v1769_v30 = vld [vmem:[#allocation8 + $0x44] ss:$8 sps:$4 sm:$0xff]   ;;  %v1562_v32 = vcombine.high %v96_v26, %v100_v28  ;;  %v1774_v33 = vld [vmem:[#allocation8 + $0x40] ss:$8 sps:$4 sm:$0xff]   ;;  %v1775_v36 = vld [vmem:[#allocation8 + $0x34] ss:$8 sps:$4 sm:$0xff]   ;;  %v1561_v37 = vcombine.low %v96_v26, %v100_v28  ;;  %v1572_v39 = vcombine.high %v105_v34, %v109_v35  ;;  %v1571_v43 = vcombine.low %v105_v34, %v109_v35  ;;  %p2073_p1 = pnand %p2072_p0, %p2066_p11 }
  0x49   :  { %251 = vmatpush1.bf16.msra.mxu1 %v1557_v10  ;;  %v97_v38 = vld [vmem:[#allocation5 + $0x18] sm:$0xff]  ;;  %v1781_v42 = vld [vmem:[#allocation8 + $0x24] ss:$8 sps:$4 sm:$0xff]   ;;  %v1786_v45 = vld [vmem:[#allocation8 + $0x20] ss:$8 sps:$4 sm:$0xff]  }
  0x4a   :  { %289 = vmatprep.subr.bf16.mxu1 %v1568_v12  ;;  %1199 = vmatpush1.bf16.msra.mxu0 %v1762_v21  ;;  %v101_v40 = vld [vmem:[#allocation5 + $0x38] sm:$0xff]  ;;  %v1793_v50 = vld [vmem:[#allocation8 + $0x4] ss:$8 sps:$4 sm:$0xff]   ;;  %v1798_v53 = vld [vmem:[#allocation8] ss:$8 sps:$4 sm:$0xff]  }
  0x4b   :  { %1200 = vmatprep.subr.bf16.mxu0 %v1763_v24  ;;  %v1780_v41 = vld [vmem:[#allocation8 + $0x30] ss:$8 sps:$4 sm:$0xff]   ;;  %v1564_v44 = vcombine.high %v97_v38, %v101_v40  ;;  %v1787_v46 = vld [vmem:[#allocation8 + $0x14] ss:$8 sps:$4 sm:$0xff]   ;;  %v1563_v47 = vcombine.low %v97_v38, %v101_v40  ;;  %v1773_v52 = vld [vmem:[#allocation8 + $0x164] ss:$8 sps:$4 sm:$0xff]  }
  0x4c   :  { %1573 = vmatmul.mubr.msk.bf16.vlgmr.msra.gmra.mxu1 %vm232_vm0, %v2162_v17  ;;  %v1767_v48 = vld [vmem:[#allocation8 + $0x174] ss:$8 sps:$4 sm:$0xff]   ;;  %v1792_v49 = vld [vmem:[#allocation8 + $0x10] ss:$8 sps:$4 sm:$0xff]   ;;  %v1771_v55 = vld [vmem:[#allocation8 + $0x160] ss:$8 sps:$4 sm:$0xff]  }
  0x4d   :  { %290 = vmatpush1.bf16.msra.mxu1 %v1567_v19  ;;  %309 = vmatprep.mubr.bf16.mxu1 %v2104_v0  ;;  %v1765_v51 = vld [vmem:[#allocation8 + $0x170] ss:$8 sps:$4 sm:$0xff]   ;;  %v1799_v54 = vld [vmem:[#allocation8 + $0xf4] ss:$8 sps:$4 sm:$0xff]   ;;  %v1805_v58 = vld [vmem:[#allocation8 + $0xe4] ss:$8 sps:$4 sm:$0xff]  }
  0x4e   :  { %291 = vmatprep.subr.bf16.mxu1 %v1560_v20  ;;  %1201 = vmatpush1.bf16.msra.mxu0 %v1768_v29  ;;  %v1779_v56 = vld [vmem:[#allocation8 + $0x154] ss:$8 sps:$4 sm:$0xff]   ;;  %v1804_v57 = vld [vmem:[#allocation8 + $0xf0] ss:$8 sps:$4 sm:$0xff]   ;;  %v1785_v60 = vld [vmem:[#allocation8 + $0x144] ss:$8 sps:$4 sm:$0xff]  }
  0x4f   :  { %1202 = vmatprep.subr.bf16.mxu0 %v1769_v30  ;;  %v1777_v59 = vld [vmem:[#allocation8 + $0x150] ss:$8 sps:$4 sm:$0xff]   ;;  %v1810_v61 = vld [vmem:[#allocation8 + $0xe0] ss:$8 sps:$4 sm:$0xff]   ;;  %v1811_v62 = vld [vmem:[#allocation8 + $0xd4] ss:$8 sps:$4 sm:$0xff]  }
  0x50   :  { %v1783_v63 = vld [vmem:[#allocation8 + $0x140] ss:$8 sps:$4 sm:$0xff]   ;;  %v1816_v1 = vld [vmem:[#allocation8 + $0xd0] ss:$8 sps:$4 sm:$0xff]   ;;  %v1817_v2 = vld [vmem:[#allocation8 + $0xc4] ss:$8 sps:$4 sm:$0xff]  }
  0x51   :  { %292 = vmatpush1.bf16.msra.mxu1 %v1559_v25  ;;  %v1789_v3 = vld [vmem:[#allocation8 + $0x130] ss:$8 sps:$4 sm:$0xff]   ;;  %v1797_v4 = vld [vmem:[#allocation8 + $0x124] ss:$8 sps:$4 sm:$0xff]   ;;  %v1822_v5 = vld [vmem:[#allocation8 + $0xc0] ss:$8 sps:$4 sm:$0xff]  }
  0x52   :  { %330 = vmatprep.subr.bf16.mxu1 %v1570_v27  ;;  %1203 = vmatpush1.bf16.msra.mxu0 %v1774_v33  ;;  %v1823_v6 = vld [vmem:[#allocation8 + $0xb4] ss:$8 sps:$4 sm:$0xff]   ;;  %v1795_v7 = vld [vmem:[#allocation8 + $0x120] ss:$8 sps:$4 sm:$0xff]   ;;  %v1828_v9 = vld [vmem:[#allocation8 + $0xb0] ss:$8 sps:$4 sm:$0xff]  }
  0x53   :  { %1204 = vmatprep.subr.bf16.mxu0 %v1775_v36  ;;  %v1803_v8 = vld [vmem:[#allocation8 + $0x114] ss:$8 sps:$4 sm:$0xff]   ;;  %v1829_v10 = vld [vmem:[#allocation8 + $0xa4] ss:$8 sps:$4 sm:$0xff]   ;;  %v1801_v11 = vld [vmem:[#allocation8 + $0x110] ss:$8 sps:$4 sm:$0xff]  }
  0x54   :  { %1574 = vmatmul.mubr.msk.bf16.vlgmr.msra.gmra.mxu1 %vm232_vm0, %v2162_v17  ;;  %v1809_v12 = vld [vmem:[#allocation8 + $0x104] ss:$8 sps:$4 sm:$0xff]   ;;  %v1834_v13 = vld [vmem:[#allocation8 + $0xa0] ss:$8 sps:$4 sm:$0xff]   ;;  %v1815_v15 = vld [vmem:[#allocation8 + $0x1f4] ss:$8 sps:$4 sm:$0xff]  }
  0x55   :  { %331 = vmatpush1.bf16.msra.mxu1 %v1569_v31  ;;  %350 = vmatprep.mubr.bf16.mxu1 %v2104_v0  ;;  %v1807_v14 = vld [vmem:[#allocation8 + $0x100] ss:$8 sps:$4 sm:$0xff]   ;;  %v1813_v16 = vld [vmem:[#allocation8 + $0x1f0] ss:$8 sps:$4 sm:$0xff]   ;;  %v1827_v19 = vld [vmem:[#allocation8 + $0x1d4] ss:$8 sps:$4 sm:$0xff]  }
  0x56   :  { %332 = vmatprep.subr.bf16.mxu1 %v1562_v32  ;;  %1205 = vmatpush1.bf16.msra.mxu0 %v1780_v41  ;;  %v1819_v18 = vld [vmem:[#allocation8 + $0x1e0] ss:$8 sps:$4 sm:$0xff]   ;;  %v1825_v20 = vld [vmem:[#allocation8 + $0x1d0] ss:$8 sps:$4 sm:$0xff]   ;;  %v1833_v21 = vld [vmem:[#allocation8 + $0x1c4] ss:$8 sps:$4 sm:$0xff]  }
  0x57   :  { %1206 = vmatprep.subr.bf16.mxu0 %v1781_v42  ;;  %v1831_v22 = vld [vmem:[#allocation8 + $0x1c0] ss:$8 sps:$4 sm:$0xff]   ;;  %v1835_v23 = vld [vmem:[#allocation8 + $0x94] ss:$8 sps:$4 sm:$0xff]   ;;  %v1840_v25 = vld [vmem:[#allocation8 + $0x90] ss:$8 sps:$4 sm:$0xff]  }
  0x58   :  { %v1839_v24 = vld [vmem:[#allocation8 + $0x1b4] ss:$8 sps:$4 sm:$0xff]   ;;  %v1841_v26 = vld [vmem:[#allocation8 + $0x84] ss:$8 sps:$4 sm:$0xff]   ;;  %v1846_v27 = vld [vmem:[#allocation8 + $0x80] ss:$8 sps:$4 sm:$0xff]  }
  0x59   :  { %333 = vmatpush1.bf16.msra.mxu1 %v1561_v37  ;;  %v1837_v28 = vld [vmem:[#allocation8 + $0x1b0] ss:$8 sps:$4 sm:$0xff]   ;;  %v1845_v29 = vld [vmem:[#allocation8 + $0x1a4] ss:$8 sps:$4 sm:$0xff]   ;;  %v1852_v30 = vld [vmem:[#allocation8 + $0x274] ss:$8 sps:$4 sm:$0xff]   ;;  %v112_v37 = vlaneseq }
  0x5a   :  { %371 = vmatprep.subr.bf16.mxu1 %v1572_v39  ;;  %1207 = vmatpush1.bf16.msra.mxu0 %v1786_v45  ;;  %v1843_v31 = vld [vmem:[#allocation8 + $0x1a0] ss:$8 sps:$4 sm:$0xff]   ;;  %v1849_v32 = vld [vmem:[#allocation8 + $0x194] ss:$8 sps:$4 sm:$0xff]   ;;  %v1847_v33 = vld [vmem:[#allocation8 + $0x190] ss:$8 sps:$4 sm:$0xff]  }
  0x5b   :  { %1208 = vmatprep.subr.bf16.mxu0 %v1787_v46  ;;  %v1855_v34 = vld [vmem:[#allocation8 + $0x184] ss:$8 sps:$4 sm:$0xff]   ;;  %v1853_v35 = vld [vmem:[#allocation8 + $0x180] ss:$8 sps:$4 sm:$0xff]   ;;  %v1864_v36 = vld [vmem:[#allocation8 + $0x374] ss:$8 sps:$4 sm:$0xff]  }
  0x5c   :  { %1575 = vmatmul.mubr.msk.bf16.vlgmr.msra.gmra.mxu1 %vm232_vm0, %v2162_v17  ;;  %v2175_v38 = vshrl.u32 %v112_v37, 7  ;;  %v2178_v40 = vld [vmem:[#allocation7] sm:$0xff] }
  0x5d   :  { %372 = vmatpush1.bf16.msra.mxu1 %v1571_v43  ;;  %391 = vmatprep.mubr.bf16.mxu1 %v2104_v0  ;;  %v1791_v0 = vld [vmem:[#allocation8 + $0x134] ss:$8 sps:$4 sm:$0xff]  }
  0x5e   :  { %373 = vmatprep.subr.bf16.mxu1 %v1564_v44  ;;  %1209 = vmatpush1.bf16.msra.mxu0 %v1792_v49  ;;  %v114_v39 = vsub.s32 0, %v2175_v38  ;;  %v118_v41 = vsub.s32 1, %v2175_v38  ;;  %v122_v46 = vsub.s32 2, %v2175_v38  ;;  %v126_v49 = vsub.s32 3, %v2175_v38  ;;  %v1888_v37 = vld [vmem:[#allocation8 + $0x334] ss:$8 sps:$4 sm:$0xff]  }
  0x5f   :  { %1210 = vmatprep.subr.bf16.mxu0 %v1793_v50 }
  0x60   :  { %v115_v42 = vrot.slane %v2178_v40, %v114_v39  ;;  %v119_v43 = vrot.slane %v2178_v40, %v118_v41 }
  0x61   :  { %374 = vmatpush1.bf16.msra.mxu1 %v1563_v47 }
  0x62   :  { %1237 = vmatprep.subr.bf16.mxu1 %v1767_v48  ;;  %1211 = vmatpush1.bf16.msra.mxu0 %v1798_v53 }
  0x63   :  { %1212 = vmatprep.subr.bf16.mxu0 %v1799_v54 }
  0x64   :  { %1576 = vmatmul.mubr.msk.bf16.vlgmr.msra.gmra.mxu1 %vm232_vm0, %v2162_v17  ;;  %v1821_v17 = vld [vmem:[#allocation8 + $0x1e4] ss:$8 sps:$4 sm:$0xff]  }
  0x65   :  { %1238 = vmatpush1.bf16.msra.mxu1 %v1765_v51 }
  0x66   :  { %1239 = vmatprep.subr.bf16.mxu1 %v1773_v52  ;;  %1213 = vmatpush2.bf16.msra.mxu0 %v1804_v57  ;;  %v123_v52 = vrot.slane %v2178_v40, %v122_v46  ;;  %v127_v57 = vrot.slane %v2178_v40, %v126_v49  ;;  %v1886_v46 = vld [vmem:[#allocation8 + $0x330] ss:$8 sps:$4 sm:$0xff]   ;;  %v1894_v49 = vld [vmem:[#allocation8 + $0x324] ss:$8 sps:$4 sm:$0xff]  }
  0x67   :  { %1214 = vmatprep.subr.bf16.mxu0 %v1805_v58 }
  0x69   :  { %1240 = vmatpush1.bf16.msra.mxu1 %v1771_v55 }
  0x6a   :  { %1241 = vmatprep.subr.bf16.mxu1 %v1779_v56  ;;  %1215 = vmatpush2.bf16.msra.mxu0 %v1810_v61  ;;  %v1850_v56 = vld [vmem:[#allocation8 + $0x270] ss:$8 sps:$4 sm:$0xff]  }
  0x6b   :  { %1216 = vmatprep.subr.bf16.mxu0 %v1811_v62 }
  0x6d   :  { %1242 = vmatpush1.bf16.msra.mxu1 %v1777_v59 }
  0x6e   :  { %1243 = vmatprep.subr.bf16.mxu1 %v1785_v60  ;;  %1217 = vmatpush2.bf16.msra.mxu0 %v1816_v1  ;;  %v1858_v60 = vld [vmem:[#allocation8 + $0x264] ss:$8 sps:$4 sm:$0xff]   ;;  %v134_v1 = vsub.s32 5, %v2175_v38 }
  0x6f   :  { %1218 = vmatprep.subr.bf16.mxu0 %v1817_v2 }
  0x71   :  { %1244 = vmatpush1.bf16.msra.mxu1 %v1783_v63 }
  0x72   :  { %1245 = vmatprep.subr.bf16.mxu1 %v1791_v0  ;;  %1219 = vmatpush2.bf16.msra.mxu0 %v1822_v5  ;;  %v1856_v0 = vld [vmem:[#allocation8 + $0x260] ss:$8 sps:$4 sm:$0xff]  }
  0x73   :  { %1220 = vmatprep.subr.bf16.mxu0 %v1823_v6 }
  0x75   :  { %1246 = vmatpush1.bf16.msra.mxu1 %v1789_v3 }
  0x76   :  { %1247 = vmatprep.subr.bf16.mxu1 %v1797_v4  ;;  %1221 = vmatpush2.bf16.msra.mxu0 %v1828_v9  ;;  %v1861_v4 = vld [vmem:[#allocation8 + $0x254] ss:$8 sps:$4 sm:$0xff]   ;;  %v1862_v9 = vld [vmem:[#allocation8 + $0x370] ss:$8 sps:$4 sm:$0xff]  }
  0x77   :  { %1222 = vmatprep.subr.bf16.mxu0 %v1829_v10  ;;  %v135_v10 = vrot.slane %v2178_v40, %v134_v1  ;;  %v1918_v1 = vld [vmem:[#allocation8 + $0x3e4] ss:$8 sps:$4 sm:$0xff]  }
  0x79   :  { %1248 = vmatpush1.bf16.msra.mxu1 %v1795_v7 }
  0x7a   :  { %1249 = vmatprep.subr.bf16.mxu1 %v1803_v8  ;;  %1223 = vmatpush2.bf16.msra.mxu0 %v1834_v13  ;;  %v1859_v8 = vld [vmem:[#allocation8 + $0x250] ss:$8 sps:$4 sm:$0xff]   ;;  %v1870_v13 = vld [vmem:[#allocation8 + $0x364] ss:$8 sps:$4 sm:$0xff]  }
  0x7b   :  { %1224 = vmatprep.subr.bf16.mxu0 %v1835_v23 }
  0x7d   :  { %1250 = vmatpush1.bf16.msra.mxu1 %v1801_v11 }
  0x7e   :  { %1251 = vmatprep.subr.bf16.mxu1 %v1809_v12  ;;  %1225 = vmatpush2.bf16.msra.mxu0 %v1840_v25  ;;  %v1867_v12 = vld [vmem:[#allocation8 + $0x244] ss:$8 sps:$4 sm:$0xff]   ;;  %v1871_v25 = vld [vmem:[#allocation8 + $0x230] ss:$8 sps:$4 sm:$0xff]  }
  0x7f   :  { %1226 = vmatprep.subr.bf16.mxu0 %v1841_v26  ;;  %v1874_v26 = vld [vmem:[#allocation8 + $0x350] ss:$8 sps:$4 sm:$0xff]  }
  0x81   :  { %1252 = vmatpush1.bf16.msra.mxu1 %v1807_v14 }
  0x82   :  { %1253 = vmatprep.subr.bf16.mxu1 %v1815_v15  ;;  %1227 = vmatpush2.bf16.msra.mxu0 %v1846_v27 }
  0x83   :  { %1278 = vmatprep.subr.bf16.mxu0 %v1852_v30  ;;  %v1882_v30 = vld [vmem:[#allocation8 + $0x344] ss:$8 sps:$4 sm:$0xff]  }
  0x85   :  { %1254 = vmatpush2.bf16.msra.mxu1 %v1813_v16  ;;  %v1865_v16 = vld [vmem:[#allocation8 + $0x240] ss:$8 sps:$4 sm:$0xff]  }
  0x86   :  { %1255 = vmatprep.subr.bf16.mxu1 %v1821_v17  ;;  %v1868_v17 = vld [vmem:[#allocation8 + $0x360] ss:$8 sps:$4 sm:$0xff]  }
  0x89   :  { %1256 = vmatpush2.bf16.msra.mxu1 %v1819_v18 }
  0x8a   :  { %1257 = vmatprep.subr.bf16.mxu1 %v1827_v19  ;;  %v142_v19 = vsub.s32 7, %v2175_v38 }
  0x8d   :  { %1258 = vmatpush2.bf16.msra.mxu1 %v1825_v20  ;;  %v1873_v20 = vld [vmem:[#allocation8 + $0x234] ss:$8 sps:$4 sm:$0xff]  }
  0x8e   :  { %1259 = vmatprep.subr.bf16.mxu1 %v1833_v21  ;;  %v1876_v21 = vld [vmem:[#allocation8 + $0x354] ss:$8 sps:$4 sm:$0xff]  }
  0x91   :  { %1260 = vmatpush2.bf16.msra.mxu1 %v1831_v22 }
  0x92   :  { %1261 = vmatprep.subr.bf16.mxu1 %v1839_v24 }
  0x95   :  { %1262 = vmatpush2.bf16.msra.mxu1 %v1837_v28  ;;  %v143_v28 = vrot.slane %v2178_v40, %v142_v19 }
  0x96   :  { %1263 = vmatprep.subr.bf16.mxu1 %v1845_v29  ;;  %v1879_v29 = vld [vmem:[#allocation8 + $0x224] ss:$8 sps:$4 sm:$0xff]  }
  0x99   :  { %1264 = vmatpush2.bf16.msra.mxu1 %v1843_v31 }
  0x9a   :  { %1265 = vmatprep.subr.bf16.mxu1 %v1849_v32 }
  0x9d   :  { %1266 = vmatpush2.bf16.msra.mxu1 %v1847_v33  ;;  %v1877_v33 = vld [vmem:[#allocation8 + $0x220] ss:$8 sps:$4 sm:$0xff]  }
  0x9e   :  { %1267 = vmatprep.subr.bf16.mxu1 %v1855_v34  ;;  %v1880_v34 = vld [vmem:[#allocation8 + $0x340] ss:$8 sps:$4 sm:$0xff]  }
  0xa1   :  { %1268 = vmatpush2.bf16.msra.mxu1 %v1853_v35 }
  0xa2   :  { %1319 = vmatprep.subr.bf16.mxu1 %v1864_v36  ;;  %v1885_v36 = vld [vmem:[#allocation8 + $0x214] ss:$8 sps:$4 sm:$0xff]  }
 0x10c   :  { %v270_v44 = vpop.f32.mrf.mxu1 }
 0x10d   :  { %v271_v45 = vadd.f32 %v270_v44, %v115_v42 }
 0x10e   :  { %v272_v47 = vpop.f32.mrf.mxu1 }
 0x10f   :  { %v273_v48 = vadd.f32 %v272_v47, %v119_v43  ;;  %v400_v50 = vmax.f32 %v271_v45, 0.0  ;;  %v1883_v45 = vld [vmem:[#allocation8 + $0x210] ss:$8 sps:$4 sm:$0xff]  }
 0x110   :  { %v274_v51 = vpop.f32.mrf.mxu1 }
 0x111   :  { %v401_v53 = vmax.f32 %v273_v48, 0.0  ;;  %v408_v58 = vpack.c.bf16 %v400_v50, %v400_v50  ;;  %v1891_v48 = vld [vmem:[#allocation8 + $0x204] ss:$8 sps:$4 sm:$0xff]   ;;  %v1889_v50 = vld [vmem:[#allocation8 + $0x200] ss:$8 sps:$4 sm:$0xff]  }
 0x112   :  { %v275_v54 = vpop.f32.mrf.mxu1  ;;  %v1892_v51 = vld [vmem:[#allocation8 + $0x320] ss:$8 sps:$4 sm:$0xff]  }
 0x113   :  { %v409_v55 = vpack.c.bf16 %v401_v53, %v401_v53  ;;  %v1900_v53 = vld [vmem:[#allocation8 + $0x314] ss:$8 sps:$4 sm:$0xff]   ;;  %v1895_v54 = vld [vmem:[#allocation8 + $0x2f0] ss:$8 sps:$4 sm:$0xff]  }
 0x114   :  { %v311_v59 = vpop.f32.mrf.mxu1 }
 0x115   :  { %v312_v61 = vadd.f32 %v311_v59, %v123_v52  ;;  %1228 = vmatprep.mubr.bf16.mxu0 %v409_v55  ;;  %v1897_v52 = vld [vmem:[#allocation8 + $0x2f4] ss:$8 sps:$4 sm:$0xff]   ;;  %v1898_v55 = vld [vmem:[#allocation8 + $0x310] ss:$8 sps:$4 sm:$0xff]   ;;  %v1904_v59 = vld [vmem:[#allocation8 + $0x300] ss:$8 sps:$4 sm:$0xff]  }
 0x116   :  { %v313_v62 = vpop.f32.mrf.mxu1  ;;  %1229 = vmatmul.mubr.bf16.vlgmr.msra.gmra.mxu0 %v408_v58  ;;  %v1901_v58 = vld [vmem:[#allocation8 + $0x2e0] ss:$8 sps:$4 sm:$0xff]  }
 0x117   :  { %v314_v63 = vadd.f32 %v313_v62, %v127_v57  ;;  %1279 = vmatpush1.bf16.msra.mxu0 %v1850_v56  ;;  %v402_v2 = vmax.f32 %v312_v61, 0.0  ;;  %v1903_v56 = vld [vmem:[#allocation8 + $0x2e4] ss:$8 sps:$4 sm:$0xff]   ;;  %v1912_v61 = vld [vmem:[#allocation8 + $0x3f4] ss:$8 sps:$4 sm:$0xff]  }
 0x118   :  { %v315_v3 = vpop.f32.mrf.mxu1  ;;  %1280 = vmatprep.subr.bf16.mxu0 %v1858_v60  ;;  %v1906_v57 = vld [vmem:[#allocation8 + $0x304] ss:$8 sps:$4 sm:$0xff]   ;;  %v1909_v60 = vld [vmem:[#allocation8 + $0x2d4] ss:$8 sps:$4 sm:$0xff]   ;;  %v1907_v62 = vld [vmem:[#allocation8 + $0x2d0] ss:$8 sps:$4 sm:$0xff]  }
 0x119   :  { %v403_v5 = vmax.f32 %v314_v63, 0.0  ;;  %v410_v11 = vpack.c.bf16 %v402_v2, %v402_v2  ;;  %v1910_v63 = vld [vmem:[#allocation8 + $0x3f0] ss:$8 sps:$4 sm:$0xff]   ;;  %v1913_v2 = vld [vmem:[#allocation8 + $0x2c0] ss:$8 sps:$4 sm:$0xff]  }
 0x11a   :  { %v316_v6 = vpop.f32.mrf.mxu1  ;;  %v1916_v3 = vld [vmem:[#allocation8 + $0x3e0] ss:$8 sps:$4 sm:$0xff]  }
 0x11b   :  { %v411_v7 = vpack.c.bf16 %v403_v5, %v403_v5  ;;  %1281 = vmatpush1.bf16.msra.mxu0 %v1856_v0  ;;  %v1915_v0 = vld [vmem:[#allocation8 + $0x2c4] ss:$8 sps:$4 sm:$0xff]   ;;  %v1924_v5 = vld [vmem:[#allocation8 + $0x3d4] ss:$8 sps:$4 sm:$0xff]   ;;  %v1919_v6 = vld [vmem:[#allocation8 + $0x2b0] ss:$8 sps:$4 sm:$0xff]  }
 0x11c   :  { %1282 = vmatprep.subr.bf16.mxu0 %v1861_v4  ;;  %v2193_v14 = vpop.f32.mrf.mxu1  ;;  %v1921_v4 = vld [vmem:[#allocation8 + $0x2b4] ss:$8 sps:$4 sm:$0xff]  }
 0x11d   :  { %1269 = vmatprep.mubr.bf16.mxu1 %v411_v7  ;;  %v1922_v7 = vld [vmem:[#allocation8 + $0x3d0] ss:$8 sps:$4 sm:$0xff]  }
 0x11e   :  { %1270 = vmatmul.mubr.bf16.vlgmr.msra.gmra.mxu1 %v410_v11  ;;  %v354_v15 = vpop.f32.mrf.mxu1  ;;  %v1925_v11 = vld [vmem:[#allocation8 + $0x2a0] ss:$8 sps:$4 sm:$0xff]  }
 0x11f   :  { %1283 = vmatpush1.bf16.msra.mxu0 %v1859_v8  ;;  %1320 = vmatpush1.bf16.msra.mxu1 %v1862_v9  ;;  %v355_v18 = vadd.f32 %v354_v15, %v135_v10  ;;  %v130_v8 = vsub.s32 4, %v2175_v38  ;;  %v1927_v9 = vld [vmem:[#allocation8 + $0x2a4] ss:$8 sps:$4 sm:$0xff]   ;;  %v1933_v15 = vld [vmem:[#allocation8 + $0x294] ss:$8 sps:$4 sm:$0xff]  }
 0x120   :  { %1284 = vmatprep.subr.bf16.mxu0 %v1867_v12  ;;  %1321 = vmatprep.subr.bf16.mxu1 %v1870_v13  ;;  %v356_v22 = vpop.f32.mrf.mxu1  ;;  %v1930_v10 = vld [vmem:[#allocation8 + $0x3c4] ss:$8 sps:$4 sm:$0xff]   ;;  %v1928_v12 = vld [vmem:[#allocation8 + $0x3c0] ss:$8 sps:$4 sm:$0xff]  }
 0x121   :  { %v405_v23 = vmax.f32 %v355_v18, 0.0  ;;  %v131_v13 = vrot.slane %v2178_v40, %v130_v8  ;;  %v1934_v18 = vld [vmem:[#allocation8 + $0x3b0] ss:$8 sps:$4 sm:$0xff]   ;;  %v1942_v22 = vld [vmem:[#allocation8 + $0x3a4] ss:$8 sps:$4 sm:$0xff]  }
 0x122   :  { %v357_v24 = vpop.f32.mrf.mxu1 }
 0x123   :  { %1285 = vmatpush1.bf16.msra.mxu0 %v1865_v16  ;;  %1322 = vmatpush1.bf16.msra.mxu1 %v1868_v17  ;;  %v413_v27 = vpack.c.bf16 %v405_v23, %v405_v23  ;;  %v1936_v16 = vld [vmem:[#allocation8 + $0x3b4] ss:$8 sps:$4 sm:$0xff]   ;;  %v1931_v17 = vld [vmem:[#allocation8 + $0x290] ss:$8 sps:$4 sm:$0xff]   ;;  %v353_v19 = vadd.f32 %v2193_v14, %v131_v13  ;;  %v1937_v23 = vld [vmem:[#allocation8 + $0x280] ss:$8 sps:$4 sm:$0xff]  }
 0x124   :  { %1286 = vmatprep.subr.bf16.mxu0 %v1873_v20  ;;  %1323 = vmatprep.subr.bf16.mxu1 %v1876_v21  ;;  %v2197_v31 = vpop.f32.mrf.mxu1  ;;  %v138_v20 = vsub.s32 6, %v2175_v38  ;;  %v1939_v21 = vld [vmem:[#allocation8 + $0x284] ss:$8 sps:$4 sm:$0xff]   ;;  %v1940_v24 = vld [vmem:[#allocation8 + $0x3a0] ss:$8 sps:$4 sm:$0xff]  }
 0x125   :  { %1310 = vmatprep.mubr.bf16.mxu0 %v413_v27  ;;  %v1945_v27 = vld [vmem:[#allocation8 + $0x394] ss:$8 sps:$4 sm:$0xff]  }
 0x126   :  { %v395_v32 = vpop.f32.mrf.mxu1 }
 0x127   :  { %1287 = vmatpush1.bf16.msra.mxu0 %v1871_v25  ;;  %1324 = vmatpush1.bf16.msra.mxu1 %v1874_v26  ;;  %v396_v35 = vadd.f32 %v395_v32, %v143_v28  ;;  %v404_v25 = vmax.f32 %v353_v19, 0.0  ;;  %v139_v26 = vrot.slane %v2178_v40, %v138_v20  ;;  %v1943_v28 = vld [vmem:[#allocation8 + $0x390] ss:$8 sps:$4 sm:$0xff]   ;;  %v1946_v32 = vld [vmem:[#allocation8 + $0x380] ss:$8 sps:$4 sm:$0xff]  }
 0x128   :  { %1288 = vmatprep.subr.bf16.mxu0 %v1879_v29  ;;  %1325 = vmatprep.subr.bf16.mxu1 %v1882_v30  ;;  %v397_v42 = vpop.f32.mrf.mxu1  ;;  %v1948_v30 = vld [vmem:[#allocation8 + $0x384] ss:$8 sps:$4 sm:$0xff]   ;;  %v1949_v40 = vld [vmem:[#allocation10 + $0x78] sm:$0xff]   ;;  %v1705_v19 = vld [vmem:[%s2224_s6] ss:$0 sm:$0xff] }
 0x129   :  { %v407_v43 = vmax.f32 %v396_v35, 0.0  ;;  %v412_v14 = vpack.c.bf16 %v404_v25, %v404_v25  ;;  %v394_v29 = vadd.f32 %v2197_v31, %v139_v26  ;;  %v1950_v35 = vld [vmem:[#allocation10 + $0x38] sm:$0xff]   ;;  %v1953_v42 = vld [vmem:[#allocation10 + $0x68] sm:$0xff]  }
 0x12a   :  { %v398_v44 = vpop.f32.mrf.mxu1  ;;  %v1954_v31 = vld [vmem:[#allocation10 + $0x28] sm:$0xff]  }
 0x12b   :  { %1289 = vmatpush1.bf16.msra.mxu0 %v1877_v33  ;;  %1326 = vmatpush1.bf16.msra.mxu1 %v1880_v34  ;;  %v415_v47 = vpack.c.bf16 %v407_v43, %v407_v43  ;;  %v406_v33 = vmax.f32 %v394_v29, 0.0  ;;  %v1955_v43 = vld [vmem:[#allocation10 + $0x60] sm:$0xff]  }
 0x12c   :  { %1290 = vmatprep.subr.bf16.mxu0 %v1885_v36  ;;  %1327 = vmatprep.subr.bf16.mxu1 %v1888_v37  ;;  %v1951_v36 = vld [vmem:[#allocation10 + $0x70] sm:$0xff]   ;;  %v1956_v44 = vld [vmem:[#allocation10 + $0x20] sm:$0xff]  }
 0x12d   :  { %1351 = vmatprep.mubr.bf16.mxu1 %v415_v47  ;;  %v414_v34 = vpack.c.bf16 %v406_v33, %v406_v33  ;;  %v1952_v37 = vld [vmem:[#allocation10 + $0x30] sm:$0xff]  }
 0x12e   :  { %v1959_v47 = vld [vmem:[#allocation10 + $0x50] sm:$0xff]  }
 0x12f   :  { %1291 = vmatpush1.bf16.msra.mxu0 %v1883_v45  ;;  %1328 = vmatpush1.bf16.msra.mxu1 %v1886_v46  ;;  %v1957_v45 = vld [vmem:[#allocation10 + $0x58] sm:$0xff]  }
 0x130   :  { %1292 = vmatprep.subr.bf16.mxu0 %v1891_v48  ;;  %1329 = vmatprep.subr.bf16.mxu1 %v1894_v49  ;;  %v1958_v46 = vld [vmem:[#allocation10 + $0x18] sm:$0xff]   ;;  %v1960_v48 = vld [vmem:[#allocation10 + $0x10] sm:$0xff]   ;;  %v1961_v49 = vld [vmem:[#allocation10 + $0x48] sm:$0xff]  }
 0x133   :  { %1293 = vmatpush1.bf16.msra.mxu0 %v1889_v50  ;;  %1330 = vmatpush1.bf16.msra.mxu1 %v1892_v51  ;;  %v1962_v50 = vld [vmem:[#allocation10 + $0x8] sm:$0xff]   ;;  %v1963_v51 = vld [vmem:[#allocation10 + $0x40] sm:$0xff]  }
 0x134   :  { %1294 = vmatprep.subr.bf16.mxu0 %v1897_v52  ;;  %1331 = vmatprep.subr.bf16.mxu1 %v1900_v53  ;;  %v1964_v52 = vld [vmem:[#allocation10] sm:$0xff]  }
 0x137   :  { %1295 = vmatpush2.bf16.msra.mxu0 %v1895_v54  ;;  %1332 = vmatpush1.bf16.msra.mxu1 %v1898_v55 }
 0x138   :  { %1296 = vmatprep.subr.bf16.mxu0 %v1903_v56  ;;  %1333 = vmatprep.subr.bf16.mxu1 %v1906_v57 }
 0x13b   :  { %1297 = vmatpush2.bf16.msra.mxu0 %v1901_v58  ;;  %1334 = vmatpush1.bf16.msra.mxu1 %v1904_v59 }
 0x13c   :  { %1298 = vmatprep.subr.bf16.mxu0 %v1909_v60  ;;  %1335 = vmatprep.subr.bf16.mxu1 %v1912_v61  ;;  %v544_v61 = vld [vmem:[%s2222_s4] sm:$0x3] }
 0x13f   :  { %1299 = vmatpush2.bf16.msra.mxu0 %v1907_v62  ;;  %1336 = vmatpush2.bf16.msra.mxu1 %v1910_v63  ;;  %v549_v62 = vrot.slane %v544_v61, %v114_v39 }
 0x140   :  { %1300 = vmatprep.subr.bf16.mxu0 %v1915_v0  ;;  %1337 = vmatprep.subr.bf16.mxu1 %v1918_v1  ;;  %v553_v0 = vrot.slane %v544_v61, %v118_v41 }
 0x143   :  { %1301 = vmatpush2.bf16.msra.mxu0 %v1913_v2  ;;  %1338 = vmatpush2.bf16.msra.mxu1 %v1916_v3 }
 0x144   :  { %1302 = vmatprep.subr.bf16.mxu0 %v1921_v4  ;;  %1339 = vmatprep.subr.bf16.mxu1 %v1924_v5 }
 0x147   :  { %1303 = vmatpush2.bf16.msra.mxu0 %v1919_v6  ;;  %1340 = vmatpush2.bf16.msra.mxu1 %v1922_v7 }
 0x148   :  { %1304 = vmatprep.subr.bf16.mxu0 %v1927_v9  ;;  %1341 = vmatprep.subr.bf16.mxu1 %v1930_v10 }
 0x14b   :  { %1305 = vmatpush2.bf16.msra.mxu0 %v1925_v11  ;;  %1342 = vmatpush2.bf16.msra.mxu1 %v1928_v12 }
 0x14c   :  { %1306 = vmatprep.subr.bf16.mxu0 %v1933_v15  ;;  %1343 = vmatprep.subr.bf16.mxu1 %v1936_v16 }
 0x14f   :  { %1307 = vmatpush2.bf16.msra.mxu0 %v1931_v17  ;;  %1344 = vmatpush2.bf16.msra.mxu1 %v1934_v18 }
 0x150   :  { %1308 = vmatprep.subr.bf16.mxu0 %v1939_v21  ;;  %1345 = vmatprep.subr.bf16.mxu1 %v1942_v22 }
 0x153   :  { %1309 = vmatpush2.bf16.msra.mxu0 %v1937_v23  ;;  %1346 = vmatpush2.bf16.msra.mxu1 %v1940_v24 }
 0x154   :  { %1347 = vmatprep.subr.bf16.mxu1 %v1945_v27  ;;  %1722 = vmatprep.subr.bf16.mxu0 %v1949_v40 }
 0x156   :  { %1311 = vmatmul.mubr.bf16.vlgmr.msra.gmra.mxu0 %v412_v14 }
 0x157   :  { %1348 = vmatpush2.bf16.msra.mxu1 %v1943_v28  ;;  %1723 = vmatpush3.bf16.msra.mxu0 %v1950_v35 }
 0x158   :  { %1349 = vmatprep.subr.bf16.mxu1 %v1948_v30  ;;  %1724 = vmatprep.subr.bf16.mxu0 %v1951_v36 }
 0x15b   :  { %1350 = vmatpush2.bf16.msra.mxu1 %v1946_v32  ;;  %1725 = vmatpush3.bf16.msra.mxu0 %v1952_v37 }
 0x15c   :  { %1726 = vmatprep.subr.bf16.mxu0 %v1953_v42 }
 0x15e   :  { %1352 = vmatmul.mubr.bf16.vlgmr.msra.gmra.mxu1 %v414_v34 }
 0x15f   :  { %1727 = vmatpush3.bf16.msra.mxu0 %v1954_v31 }
 0x160   :  { %1728 = vmatprep.subr.bf16.mxu0 %v1955_v43 }
 0x163   :  { %1729 = vmatpush3.bf16.msra.mxu0 %v1956_v44 }
 0x164   :  { %1730 = vmatprep.subr.bf16.mxu0 %v1957_v45 }
 0x167   :  { %1731 = vmatpush3.bf16.msra.mxu0 %v1958_v46 }
 0x168   :  { %1732 = vmatprep.subr.bf16.mxu0 %v1959_v47 }
 0x16b   :  { %1733 = vmatpush3.bf16.msra.mxu0 %v1960_v48 }
 0x16c   :  { %1734 = vmatprep.subr.bf16.mxu0 %v1961_v49 }
 0x16f   :  { %1735 = vmatpush3.bf16.msra.mxu0 %v1962_v50 }
 0x170   :  { %1736 = vmatprep.subr.bf16.mxu0 %v1963_v51 }
 0x173   :  { %1737 = vmatpush3.bf16.msra.mxu0 %v1964_v52 }
 0x1d6   :  { %v1230_v53 = vpop.f32.mrf.mxu0 }
 0x1d7   :  { %v1231_v2 = vadd.f32 %v1230_v53, %v549_v62 }
 0x1d8   :  { %v1232_v54 = vpop.f32.mrf.mxu0 }
 0x1d9   :  { %v1233_v4 = vadd.f32 %v1232_v54, %v553_v0 }
 0x1da   :  { %v1234_v55 = vpop.f32.mrf.mxu0 }
 0x1dc   :  { %v1235_v56 = vpop.f32.mrf.mxu0 }
 0x1de   :  { %v1271_v57 = vpop.f32.mrf.mxu1 }
 0x1df   :  { %v1272_v5 = vadd.f32 %v1271_v57, %v1231_v2 }
 0x1e0   :  { %v1273_v58 = vpop.f32.mrf.mxu1 }
 0x1e1   :  { %v1274_v7 = vadd.f32 %v1273_v58, %v1233_v4 }
 0x1e2   :  { %v1275_v59 = vpop.f32.mrf.mxu1 }
 0x1e4   :  { %v1276_v60 = vpop.f32.mrf.mxu1 }
 0x216   :  { %v1312_v63 = vpop.f32.mrf.mxu0 }
 0x217   :  { %v1313_v8 = vadd.f32 %v1312_v63, %v1272_v5 }
 0x218   :  { %v1314_v1 = vpop.f32.mrf.mxu0 }
 0x219   :  { %v1315_v10 = vadd.f32 %v1314_v1, %v1274_v7 }
 0x21a   :  { %v1316_v3 = vpop.f32.mrf.mxu0 }
 0x21c   :  { %v1317_v6 = vpop.f32.mrf.mxu0 }
 0x21e   :  { %v1353_v9 = vpop.f32.mrf.mxu1 }
 0x21f   :  { %v1354_v11 = vadd.f32 %v1353_v9, %v1313_v8 }
 0x220   :  { %v1355_v12 = vpop.f32.mrf.mxu1 }
 0x221   :  { %v1356_v13 = vadd.f32 %v1355_v12, %v1315_v10  ;;  %v1360_v15 = vmax.f32 %v1354_v11, 0.0 }
 0x222   :  { %v1357_v16 = vpop.f32.mrf.mxu1 }
 0x223   :  { %v1361_v39 = vmax.f32 %v1356_v13, 0.0  ;;  %v1362_v38 = vpack.c.bf16 %v1360_v15, %v1360_v15 }
 0x224   :  { %v1358_v17 = vpop.f32.mrf.mxu1 }
 0x225   :  { %v1363_v18 = vpack.c.bf16 %v1361_v39, %v1361_v39 }
 0x227   :  { %1531 = vmatprep.mubr.bf16.mxu0 %v1363_v18 }
 0x228   :  { %1532 = vmatmul.mubr.bf16.vlgmr.msra.gmra.mxu0 %v1362_v38 }
 0x2e8   :  { %v1738_v41 = vpop.f32.mrf.mxu0 }
 0x2ea   :  { %v1739_v20 = vpop.f32.mrf.mxu0 }
 0x2eb   :  { %v1740_v21 = vadd.f32 %v1739_v20, %v1738_v41 }
 0x2ec   :  { %v1741_v22 = vpop.f32.mrf.mxu0 }
 0x2ed   :  { %v1534_v23 = vadd.f32 %v1740_v21, %v1705_v19 }
 0x2ee   :  { %v1742_v24 = vpop.f32.mrf.mxu0 }
 0x2ef   :  { %1539 = vst [vmem:[#allocation11] sm:$0xff] %v1534_v23 }
 0x2f0   :  { %2076 = shalt.err (!%p2073_p1)
}
 0x2f1   :  { %1549 = dma.vmem_to_hbm [thread:$0]  %s1547_s8, 128, %s2225_s7, [#allocation4]  }
 0x2f2   :  { %2091 = dma.done.wait [#allocation4], 128  }
 0x2f3   :  { %2092 = vsyncadd [#allocation4], 4294967168 }
 0x2f4   :  { %1553 = vsyncpa [#allocation3], 1 }
 0x2f5   :  { %1554 = vsyncpa [#allocation6], 1 }
 0x2f6   :  { %1555 = vsyncpa [#allocation9], 1 }
 0x2f7   :  { %1556 = vsyncpa [#allocation4], 1 }

</bundles_post_ra>
